<compile_context>
chip_gen: v7x
topology: tpu7x:2x2x1
jax: 0.10.0
libtpu: 0.0.40
codegen_flags: <defaults>
</compile_context>

<pallas_src>
import functools

import jax
import jax.numpy as jnp
from jax.experimental import pallas as pl
from jax.experimental.pallas import tpu as pltpu

_LANE = 128
_SUBLANE = 8
_MiB = 1 << 20

# Per-block byte budgets (conservative enough for v7x's 64 MiB physical VMEM
# with double-buffered in+out plus Mosaic temporaries; big enough to amortize
# the ~0.35 us per-grid-step overhead on v6e/v7x HBM bandwidth).
_FUSE_BLOCK_LIMIT = 4 * _MiB      # fused path: per-batch (C, HW) slab bytes
_APPLY_BLOCK_TARGET = 4 * _MiB    # pass-2 streaming-apply block bytes
_SUM_BLOCK_TARGET = 2 * _MiB      # pass-1 channel-tiled block bytes


def _pick_tile(total, unit, max_tile):
    """Tile along a second-minor dim: full extent if it fits the budget,
    otherwise the largest multiple of `unit` not exceeding max_tile."""
    if total <= max_tile:
        return total
    return max((max_tile // unit) * unit, unit)


def _vmem_limit(block_bytes):
    """Scoped-VMEM limit covering double-buffered in+out blocks plus slack.
    Always >= 32 MiB (v5e default is only 16 MiB), capped at 48 MiB so it is
    safe on v7x's 64 MiB physical VMEM."""
    need = 4 * block_bytes + 4 * _MiB
    return int(min(max(need, 32 * _MiB), 48 * _MiB))


# ----------------------------------------------------------------------------
# Fused kernel: gate + apply in one pass (2x|x| HBM traffic).
# ----------------------------------------------------------------------------
def _make_fused_kernel(inv_hw):
    def fused_kernel(x_ref, w1t_ref, w2_ref, o_ref):
        # x_ref : (1, C, HW)  one batch, full channel/spatial extent (VMEM)
        # w1t_ref: (C, C4)    fc1 weight transposed
        # w2_ref : (1, C4)    fc2 weight (row vector)
        # o_ref : (1, C, HW)
        xf = x_ref[...].astype(jnp.float32)                     # gate math in f32
        avg = jnp.sum(xf, axis=-1) * inv_hw                     # (1, C) global mean
        h = jnp.dot(avg, w1t_ref[...].astype(jnp.float32),
                    preferred_element_type=jnp.float32)         # (1, C4)
        h = jnp.maximum(h, 0.0)
        # fc2 as a VPU lane reduction (avoids a 1-output-lane MXU matmul).
        s = jnp.sum(h * w2_ref[...].astype(jnp.float32),
                    axis=-1, keepdims=True)                     # (1, 1)
        s = jnp.maximum(s, 0.0)
        g = jax.nn.sigmoid(s).reshape(1, 1, 1)                  # (1, 1, 1)
        # Multiply in the input dtype (no full-slab f32 upcast); exact for f32,
        # gate is rounded once for sub-f32 inputs.
        o_ref[...] = x_ref[...] * g.astype(o_ref.dtype)

    return fused_kernel


# ----------------------------------------------------------------------------
# Two-pass fallback kernels.
# ----------------------------------------------------------------------------
def _sum_kernel(x_ref, s_ref):
    # x_ref: (1, tc, HW) -> s_ref: (1, tc, 1) per-channel spatial sums (f32).
    s_ref[...] = jnp.sum(x_ref[...].astype(jnp.float32), axis=-1, keepdims=True)


def _apply_kernel(g_ref, x_ref, o_ref):
    # g_ref: (N,) f32 in SMEM (whole array, not gridded).
    # x_ref/o_ref: (1, tile, lanes) block of batch n.
    n = pl.program_id(0)
    w = g_ref[n]                                    # SMEM scalar load
    o_ref[...] = x_ref[...] * w.astype(o_ref.dtype)


# ----------------------------------------------------------------------------
# Wrapper
# ----------------------------------------------------------------------------
def adaptive_weight(x, w_fc1, w_fc2, *, force_two_pass=False):
    """x: (N, C, H, W); w_fc1: (C//4, C); w_fc2: (1, C//4)."""
    N, C, H, W = x.shape
    C4 = w_fc1.shape[0]
    HW = H * W
    L = C * HW
    itemsize = jnp.dtype(x.dtype).itemsize
    x_ncl = x.reshape(N, C, HW)

    slab_bytes = C * HW * itemsize

    # ------------------ fused single-pass path ------------------
    if slab_bytes <= _FUSE_BLOCK_LIMIT and not force_two_pass:
        w1t = w_fc1.T                                  # (C, C4)
        out = pl.pallas_call(
            _make_fused_kernel(1.0 / HW),
            out_shape=jax.ShapeDtypeStruct((N, C, HW), x.dtype),
            grid=(N,),
            in_specs=[
                pl.BlockSpec((1, C, HW), lambda n: (n, 0, 0)),
                pl.BlockSpec((C, C4), lambda n: (0, 0)),
                pl.BlockSpec((1, C4), lambda n: (0, 0)),
            ],
            out_specs=pl.BlockSpec((1, C, HW), lambda n: (n, 0, 0)),
            compiler_params=pltpu.CompilerParams(
                dimension_semantics=("parallel",),
                vmem_limit_bytes=_vmem_limit(slab_bytes)),
        )(x_ncl, w1t, w_fc2)
        return out.reshape(N, C, H, W)

    # ------------------ two-pass fallback ------------------
    # Pass 1: per-(n, c) spatial sums; channel-tiled, fully parallel grid.
    tc = _pick_tile(C, _SUBLANE, max(_SUM_BLOCK_TARGET // (HW * itemsize), _SUBLANE))
    sum_block_bytes = tc * HW * itemsize
    sums3 = pl.pallas_call(
        _sum_kernel,
        out_shape=jax.ShapeDtypeStruct((N, C, 1), jnp.float32),
        grid=(N, pl.cdiv(C, tc)),
        in_specs=[pl.BlockSpec((1, tc, HW), lambda n, c: (n, c, 0))],
        out_specs=pl.BlockSpec((1, tc, 1), lambda n, c: (n, c, 0)),
        compiler_params=pltpu.CompilerParams(
            dimension_semantics=("parallel", "parallel"),
            vmem_limit_bytes=_vmem_limit(sum_block_bytes)),
    )(x_ncl)

    # Tiny gate math (a few KFLOPs) in plain JAX on the (N, C) sums.
    avg = sums3.reshape(N, C) * (1.0 / HW)
    h = jnp.maximum(avg @ w_fc1.astype(jnp.float32).T, 0.0)                 # (N, C4)
    s = jnp.maximum(jnp.sum(h * w_fc2.astype(jnp.float32), axis=-1), 0.0)   # (N,)
    gates = jax.nn.sigmoid(s)                                               # (N,) f32

    # Pass 2: streaming multiply (HBM-roofline bound).
    if L % _LANE == 0:
        # Lane-dense view: every store is a full-lane store.
        rows = L // _LANE
        x3 = x.reshape(N, rows, _LANE)
        tr = _pick_tile(rows, _SUBLANE,
                        max(_APPLY_BLOCK_TARGET // (_LANE * itemsize), _SUBLANE))
        apply_block_bytes = tr * _LANE * itemsize
        out3 = pl.pallas_call(
            _apply_kernel,
            out_shape=jax.ShapeDtypeStruct((N, rows, _LANE), x.dtype),
            grid=(N, pl.cdiv(rows, tr)),
            in_specs=[
                pl.BlockSpec(memory_space=pltpu.MemorySpace.SMEM),   # gates
                pl.BlockSpec((1, tr, _LANE), lambda n, t: (n, t, 0)),
            ],
            out_specs=pl.BlockSpec((1, tr, _LANE), lambda n, t: (n, t, 0)),
            compiler_params=pltpu.CompilerParams(
                dimension_semantics=("parallel", "parallel"),
                vmem_limit_bytes=_vmem_limit(apply_block_bytes)),
        )(gates, x3)
        return out3.reshape(N, C, H, W)

    # L % 128 != 0: keep the (N, C, HW) view with channel-tiled blocks.
    # No jnp.pad / extra HBM copy; HW is the full lane extent so no
    # 128-divisibility requirement applies (edge stores are lane-masked).
    tca = _pick_tile(C, _SUBLANE, max(_APPLY_BLOCK_TARGET // (HW * itemsize), _SUBLANE))
    apply_block_bytes = tca * HW * itemsize
    out3 = pl.pallas_call(
        _apply_kernel,
        out_shape=jax.ShapeDtypeStruct((N, C, HW), x.dtype),
        grid=(N, pl.cdiv(C, tca)),
        in_specs=[
            pl.BlockSpec(memory_space=pltpu.MemorySpace.SMEM),       # gates
            pl.BlockSpec((1, tca, HW), lambda n, c: (n, c, 0)),
        ],
        out_specs=pl.BlockSpec((1, tca, HW), lambda n, c: (n, c, 0)),
        compiler_params=pltpu.CompilerParams(
            dimension_semantics=("parallel", "parallel"),
            vmem_limit_bytes=_vmem_limit(apply_block_bytes)),
    )(gates, x_ncl)
    return out3.reshape(N, C, H, W)


# ----------------------------------------------------------------------------
# Pure-JAX reference matching the PyTorch forward
# ----------------------------------------------------------------------------
def adaptive_weight_ref(x, w_fc1, w_fc2):
    avg = jnp.mean(x, axis=(2, 3))                       # (N, C)
    h = jnp.maximum(avg @ w_fc1.T, 0.0)                  # (N, C//4)
    s = jnp.maximum(h @ w_fc2.T, 0.0)                    # (N, 1)
    w = jax.nn.sigmoid(s)[:, :, None, None]              # (N, 1, 1, 1)
    return x * w


if __name__ == "__main__":
    key = jax.random.PRNGKey(0)
    k_x, k_w1, k_w2 = jax.random.split(key, 3)

    N, C, H, W = 2, 8, 16, 16
    C4 = C // 4

    x = jax.random.normal(k_x, (N, C, H, W), dtype=jnp.float32)
    # Conv2d 1x1 weights, squeezed: fc1 (C4, C), fc2 (1, C4).
    w_fc1 = jax.random.normal(k_w1, (C4, C), dtype=jnp.float32) * 0.1
    w_fc2 = jax.random.normal(k_w2, (1, C4), dtype=jnp.float32) * 0.1

    fused_fn = jax.jit(adaptive_weight)
    twopass_fn = jax.jit(functools.partial(adaptive_weight, force_two_pass=True))

    # Fused path (default for this shape).
    ref = adaptive_weight_ref(x, w_fc1, w_fc2)
    out = jax.block_until_ready(fused_fn(x, w_fc1, w_fc2))
    assert out.shape == (N, C, H, W)
    assert jnp.allclose(out, ref, atol=1e-5, rtol=1e-5)

    # Two-pass path, lane-dense apply (C*H*W % 128 == 0).
    out2p = jax.block_until_ready(twopass_fn(x, w_fc1, w_fc2))
    assert jnp.allclose(out2p, ref, atol=1e-5, rtol=1e-5)

    # Ragged spatial size (H=W=7, C*H*W % 128 != 0): exercises the no-pad paths.
    xr = jax.random.normal(k_x, (N, C, 7, 7), dtype=jnp.float32)
    refr = adaptive_weight_ref(xr, w_fc1, w_fc2)
    outr_fused = jax.block_until_ready(fused_fn(xr, w_fc1, w_fc2))
    outr_2p = jax.block_until_ready(twopass_fn(xr, w_fc1, w_fc2))
    assert jnp.allclose(outr_fused, refr, atol=1e-5, rtol=1e-5)
    assert jnp.allclose(outr_2p, refr, atol=1e-5, rtol=1e-5)

    print("KERNEL_OK")
</pallas_src>

<mosaic_0001>
module attributes {stable_mosaic.version = 11 : i64} {
  func.func @fused_kernel(%arg0: i32, %arg1: memref<1x8x256xf32, #tpu.memory_space<vmem>>, %arg2: memref<8x2xf32, #tpu.memory_space<vmem>>, %arg3: memref<1x2xf32, #tpu.memory_space<vmem>>, %arg4: memref<1x8x256xf32, #tpu.memory_space<vmem>>) attributes {dimension_semantics = [#tpu.dimension_semantics<parallel>], iteration_bounds = array<i64: 2>, scalar_prefetch = 0 : i64, scratch_operands = 0 : i64, tpu.core_type = #tpu.core_type<tc>, window_params = [{transform_indices = @transform_0, window_bounds = array<i64: 1, 8, 256>}, {pipeline_mode = #tpu.pipeline_mode<synchronous>, transform_indices = @transform_1, window_bounds = array<i64: 8, 2>}, {pipeline_mode = #tpu.pipeline_mode<synchronous>, transform_indices = @transform_2, window_bounds = array<i64: 1, 2>}, {transform_indices = @transform_3, window_bounds = array<i64: 1, 8, 256>}]} {
    %c0 = arith.constant 0 : index
    %c0_0 = arith.constant 0 : index
    %c0_1 = arith.constant 0 : index
    %0 = vector.load %arg1[%c0, %c0_0, %c0_1] : memref<1x8x256xf32, #tpu.memory_space<vmem>>, vector<1x8x256xf32>
    %cst = arith.constant dense<0.000000e+00> : vector<1x8xf32>
    %1 = vector.multi_reduction <add>, %0, %cst [2] : vector<1x8x256xf32> to vector<1x8xf32>
    %cst_2 = arith.constant 3.906250e-03 : f32
    %2 = vector.broadcast %cst_2 : f32 to vector<1x8xf32>
    %3 = arith.mulf %1, %2 : vector<1x8xf32>
    %c0_3 = arith.constant 0 : index
    %c0_4 = arith.constant 0 : index
    %4 = vector.load %arg2[%c0_3, %c0_4] : memref<8x2xf32, #tpu.memory_space<vmem>>, vector<8x2xf32>
    %cst_5 = arith.constant dense<0.000000e+00> : vector<1x2xf32>
    %5 = tpu.matmul %3, %4, %cst_5 {dimension_numbers = #tpu.dot_dimension_numbers<[1], [0], [0], [1], [0, 0, 1, 1], [], []>} : vector<1x8xf32>, vector<8x2xf32>, vector<1x2xf32> -> vector<1x2xf32>
    %cst_6 = arith.constant 0.000000e+00 : f32
    %6 = vector.broadcast %cst_6 : f32 to vector<1x2xf32>
    %7 = arith.maximumf %5, %6 : vector<1x2xf32>
    %c0_7 = arith.constant 0 : index
    %c0_8 = arith.constant 0 : index
    %8 = vector.load %arg3[%c0_7, %c0_8] : memref<1x2xf32, #tpu.memory_space<vmem>>, vector<1x2xf32>
    %9 = arith.mulf %7, %8 : vector<1x2xf32>
    %cst_9 = arith.constant dense<0.000000e+00> : vector<1xf32>
    %10 = vector.multi_reduction <add>, %9, %cst_9 [1] : vector<1x2xf32> to vector<1xf32>
    %11 = vector.shape_cast %10 : vector<1xf32> to vector<1x1xf32>
    %cst_10 = arith.constant 0.000000e+00 : f32
    %12 = vector.broadcast %cst_10 : f32 to vector<1x1xf32>
    %13 = arith.maximumf %11, %12 : vector<1x1xf32>
    %14 = arith.negf %13 : vector<1x1xf32>
    %15 = math.exp %14 : vector<1x1xf32>
    %cst_11 = arith.constant 1.000000e+00 : f32
    %16 = vector.broadcast %cst_11 : f32 to vector<1x1xf32>
    %17 = arith.addf %16, %15 : vector<1x1xf32>
    %18 = arith.divf %16, %17 : vector<1x1xf32>
    %19 = vector.shape_cast %18 : vector<1x1xf32> to vector<1x1x1xf32>
    %c0_12 = arith.constant 0 : index
    %c0_13 = arith.constant 0 : index
    %c0_14 = arith.constant 0 : index
    %20 = vector.load %arg1[%c0_12, %c0_13, %c0_14] : memref<1x8x256xf32, #tpu.memory_space<vmem>>, vector<1x8x256xf32>
    %21 = vector.broadcast %19 : vector<1x1x1xf32> to vector<1x8x256xf32>
    %22 = arith.mulf %20, %21 : vector<1x8x256xf32>
    %c0_15 = arith.constant 0 : index
    %c0_16 = arith.constant 0 : index
    %c0_17 = arith.constant 0 : index
    %23 = vector.load %arg4[%c0_15, %c0_16, %c0_17] : memref<1x8x256xf32, #tpu.memory_space<vmem>>, vector<1x8x256xf32>
    tpu.vector_store %arg4[%c0_15, %c0_16, %c0_17], %22 {strides = array<i32>} : memref<1x8x256xf32, #tpu.memory_space<vmem>>, vector<1x8x256xf32>,
    return
  }
  func.func @transform_0(%arg0: i32) -> (i32, i32, i32) {
    %c0_i32 = arith.constant 0 : i32
    %c0_i32_0 = arith.constant 0 : i32
    %c0_i32_1 = arith.constant 0 : i32
    return %arg0, %c0_i32, %c0_i32_0 : i32, i32, i32
  }
  func.func @transform_1(%arg0: i32) -> (i32, i32) {
    %c0_i32 = arith.constant 0 : i32
    %c0_i32_0 = arith.constant 0 : i32
    %c0_i32_1 = arith.constant 0 : i32
    return %c0_i32, %c0_i32_0 : i32, i32
  }
  func.func @transform_2(%arg0: i32) -> (i32, i32) {
    %c0_i32 = arith.constant 0 : i32
    %c0_i32_0 = arith.constant 0 : i32
    %c0_i32_1 = arith.constant 0 : i32
    return %c0_i32, %c0_i32_0 : i32, i32
  }
  func.func @transform_3(%arg0: i32) -> (i32, i32, i32) {
    %c0_i32 = arith.constant 0 : i32
    %c0_i32_0 = arith.constant 0 : i32
    %c0_i32_1 = arith.constant 0 : i32
    return %arg0, %c0_i32, %c0_i32_0 : i32, i32, i32
  }
}

</mosaic_0001>

<bundles_post_ra>
// kernel: adaptive_weight.1
= control target key start
LH: loop header
LB: loop body
LE: loop exit
PB: predicated region body
PF: predicated region fallthrough
CT: control target
= control target key end

     0   :  { %s401_s12 = smov 0   ;;  %s431_s0 = inlined_call_operand.vmem [shape: f32[2,8,256], index: 0, kind: input, shape index: {}]   ;;  %s432_s1 = inlined_call_operand.vmem [shape: f32[8,2], index: 1, kind: input, shape index: {}]   ;;  %s433_s2 = inlined_call_operand.vmem [shape: f32[1,2], index: 2, kind: input, shape index: {}]   ;;  %s434_s3 = inlined_call_operand.vmem [shape: f32[2,8,256], index: 3, kind: output, shape index: {}]  }
   0x1 LB: > { %s335_s13 = sadd.s32 4294967295, %s377_s12   ;;  %p339_p0 = scmp.ge.s32.totalorder %s377_s12, 1  ;;  %s377_s12 = sphi %s401_s12, %s13_s12  }
   0x2   : > { %p137_p1 = scmp.lt.s32.totalorder %s377_s12, 3 }
   0x4   : > { %p138_p2 = pnand %p339_p0, %p137_p1 }
   0x5   : > { %p161_p3 = scmp.lt.s32.totalorder (!%p138_p2), %s335_s13, 1  ;;  %v379_v3 = vmov (!%p138_p2), 0.0   ;;  %v177_v4 = vld [vmem:[%s432_s1] sm:$0xff] (!%p138_p2)  ;;  %vm380_vm0 = vmmov (!%p138_p2), 0   ;;  %v179_v5 = vlaneseq (!%p138_p2)  ;;  %vm185_vm1 = vcmask (!%p138_p2), 64512  }
   0x6   : > { %141 = sbr.rel (%p138_p2) target bundleno = 557 (0x22d), region = 32  ;;  %352 = vmatprep.subr.mxu0 (!%p138_p2), %v379_v3  ;;  %354 = vmatprep.mubr.msk.f32.mxu0 (!%p138_p2), %vm380_vm0, %v379_v3  ;;  %v259_v13 = vld [vmem:[%s433_s2] sm:$0x1] (!%p138_p2)  ;;  %vm261_vm2 = vcmask (!%p138_p2), 8192  }
   0x7   : > { %353 = vmatpush3.msra.mxu0 (!%p138_p2), %v177_v4  ;;  %v180_v6 = vand.u32 (!%p138_p2), 127, %v179_v5  ;;  %v182_v7 = vshrl.u32 (!%p138_p2), %v179_v5, 7 }
   0x9   : > { %v183_v8 = vsub.s32 (!%p138_p2), %v180_v6, %v182_v7  ;;  %v274_v23 = vsub.s32 (!%p138_p2), 0, %v182_v7 }
   0xd   : > { %s436_s13 = smov (!%p161_p3, %s335_s13), 1 }
   0xe   : > { %s348_s14 = sshll.u32 %s436_s13, 4 }
   0xf   : > { %s165_s17 = scalar_lea.vmem %s431_s0, %s348_s14  ;;  %s170_s24 = scalar_lea.vmem %s434_s3, %s348_s14 }
  0x10   : > { %v171_v0 = vld [vmem:[%s165_s17] sm:$0xff]  ;;  %v172_v1 = vld [vmem:[%s165_s17 + $0x8] sm:$0xff] }
  0x11   : > { %v173_v2 = vadd.f32 %v172_v1, %v171_v0 }
  0x13   : > { %174 = vadd.xlane.f32.xlu0 %v173_v2 }
  0xa0   : > { %v175_v9 = vpop.xlane.xlu0 %174 }
  0xa1   : > { %v176_v10 = vmul.f32 0.00390625, %v175_v9 }
  0xa3   : > { %v184_v11 = vrot.slane %v176_v10, %v183_v8 }
  0xa5   : > { %355 = vmatmul.mubr.msk.f32.vlgmr.msra.gmra.mrb[0].mxu0 %vm185_vm1, %v184_v11 }
 0x178   : > { %v254_v12 = vpop.f32.mrb[0].mxu0 }
 0x179   : > { %v258_v14 = vmax.f32 %v254_v12, 0.0  ;;  %v356_v15 = vpop.f32.mrb[1].mxu0 }
 0x17b   : > { %v260_v16 = vmul.f32 %v259_v13, %v258_v14 }
 0x17d   : > { %v262_v17 = vsel %vm261_vm2, %v260_v16, 0.0 }
 0x17e   : > { %263 = vadd.xlane.f32.xlu0 %v262_v17 }
 0x20b   : > { %v264_v18 = vpop.xlane.xlu0 %263 }
 0x20c   : > { %v265_v19 = vmax.f32 %v264_v18, 0.0 }
 0x20e   : > { %v345_v20 = vmul.f32 -1.442695, %v265_v19 }
 0x210   : > { %367 = vpow2.f32 %v345_v20 }
 0x21a   : > { %v368_v21 = vpop.eup %367 }
 0x21b   : > { %v269_v22 = vadd.f32 1.0, %v368_v21 }
 0x21d   : > { %369 = vrcp.f32 %v269_v22 }
 0x227   : > { %v370_v24 = vpop.eup %369 }
 0x228   : > { %v275_v25 = vrot.slane %v370_v24, %v274_v23 }
 0x22a   : > { %v276_v26 = vmul.f32 %v275_v25, %v171_v0  ;;  %v277_v27 = vmul.f32 %v275_v25, %v172_v1 }
 0x22c   : > { %278 = vst [vmem:[%s170_s24] sm:$0xff] %v276_v26  ;;  %279 = vst [vmem:[%s170_s24 + $0x8] sm:$0xff] %v277_v27 }
 0x22d PF: > { %s13_s12 = sadd.s32 1, %s377_s12  }
 0x22e   : > { %p10_p4 = scmp.ge.s32.totalorder %s13_s12, 4  }
 0x230   :  { %12 = sbr.rel (!%p10_p4) target bundleno = 1 (0x1), region = 62 }

</bundles_post_ra>
